<compile_context>
chip_gen: v7x
topology: tpu7x:2x2x1
jax: 0.10.0
libtpu: 0.0.40
codegen_flags: <defaults>
</compile_context>

<pallas_src>
import functools

import jax
import jax.numpy as jnp
from jax.experimental import pallas as pl
from jax.experimental.pallas import tpu as pltpu


def _aelif_kernel(u0_ref, w0_ref, s0_ref, inp_ref, clamps_ref, unclamps_ref,
                  u_ref, s_ref, w_ref, s_sc,
                  *, dt_over_tau, dt_over_tau_w, inv_sharpness, sharpness,
                  R, u_rest, spike_threshold, firing_threshold, a_w, b_w_tau_w):
    t = pl.program_id(0)

    # First step: pull the initial state into the VMEM-resident state buffers.
    @pl.when(t == 0)
    def _():
        u_ref[...] = u0_ref[...]
        w_ref[...] = w0_ref[...]
        s_sc[...] = s0_ref[...].astype(jnp.float32)

    u = u_ref[...]
    w = w_ref[...]
    s = s_sc[...]                                  # previous-step spikes (0/1 f32)
    I = inp_ref[0]                                 # collect_I: no dendrites attached
    clamps = clamps_ref[0].astype(jnp.float32)     # int8 -> 0/1 f32 (in-kernel)
    unclamps = unclamps_ref[0].astype(jnp.float32)

    # --- LIFPopulation.compute_potential ---
    u = u * (1.0 - s) + s * u_rest
    u = u - dt_over_tau * (u - u_rest - R * I)
    # --- ELIFPopulation.compute_potential (exponential firing term) ---
    u = u + dt_over_tau * (sharpness * jnp.exp((u - firing_threshold) * inv_sharpness))
    # --- AELIFPopulation.compute_potential (adaptation current) ---
    u = u - R * w
    # --- compute_spike: s = (u > theta); s = (s & ~unclamps) | clamps ---
    s_new = (u > spike_threshold).astype(jnp.float32)
    s_new = jnp.maximum(s_new * (1.0 - unclamps), clamps)
    # --- AELIFPopulation.compute_w ---
    w_new = w + dt_over_tau_w * (a_w * (u - u_rest) - w + b_w_tau_w * s_new)

    # Keep state resident in VMEM across grid steps.
    u_ref[...] = u
    w_ref[...] = w_new
    s_sc[...] = s_new

    # Emit the spike mask (int8) once, on the last step.
    @pl.when(t == pl.num_programs(0) - 1)
    def _():
        s_ref[...] = s_new.astype(jnp.int8)


def aelif_forward(u, w, s, direct_input, clamps, unclamps, *,
                  dt=1.0, tau=20.0, R=1.0, resting_potential=-70.6,
                  spike_threshold=-40.0, sharpness=2.0, firing_threshold=-50.4,
                  a_w=4.0, b_w=0.0805, tau_w=144.0):
    """Run T = direct_input.shape[0] fused AELIF steps in one pallas_call.

    u, w: population-shaped f32 state; s: population-shaped spike mask (int8/bool).
    direct_input, clamps, unclamps: (T, *population_shape) per-step inputs.
    Returns (u_new f32, s_new bool, w_new f32) after T steps.
    """
    pop_shape = u.shape
    nd = len(pop_shape)
    assert direct_input.shape[1:] == pop_shape and clamps.shape[1:] == pop_shape \
        and unclamps.shape[1:] == pop_shape, "time-major (T, *pop_shape) inputs expected"
    T = direct_input.shape[0]

    u = u.astype(jnp.float32)
    w = w.astype(jnp.float32)
    s = s.astype(jnp.int8)
    direct_input = direct_input.astype(jnp.float32)
    clamps = clamps.astype(jnp.int8)
    unclamps = unclamps.astype(jnp.int8)

    kernel = functools.partial(
        _aelif_kernel,
        dt_over_tau=float(dt) / float(tau),
        dt_over_tau_w=float(dt) / float(tau_w),
        inv_sharpness=1.0 / float(sharpness),
        sharpness=float(sharpness),
        R=float(R),
        u_rest=float(resting_potential),
        spike_threshold=float(spike_threshold),
        firing_threshold=float(firing_threshold),
        a_w=float(a_w),
        b_w_tau_w=float(b_w) * float(tau_w))

    def state_index_map(t):            # grid-resident state block (constant index)
        return (0,) * nd

    def step_index_map(t):             # streamed per-time-step block
        return (t,) + (0,) * nd

    state_spec = pl.BlockSpec(pop_shape, state_index_map)
    step_spec = pl.BlockSpec((1,) + pop_shape, step_index_map)

    u_new, s_new, w_new = pl.pallas_call(
        kernel,
        grid=(T,),
        in_specs=[state_spec, state_spec, state_spec,   # u0, w0, s0
                  step_spec, step_spec, step_spec],     # direct_input, clamps, unclamps
        out_specs=(state_spec, state_spec, state_spec), # u, s (int8), w
        out_shape=(
            jax.ShapeDtypeStruct(pop_shape, jnp.float32),
            jax.ShapeDtypeStruct(pop_shape, jnp.int8),
            jax.ShapeDtypeStruct(pop_shape, jnp.float32),
        ),
        scratch_shapes=[pltpu.VMEM(pop_shape, jnp.float32)],   # previous spikes (f32)
        input_output_aliases={0: 0, 1: 2, 2: 1},               # u->u, w->w, s->s in place
        compiler_params=pltpu.CompilerParams(
            dimension_semantics=("arbitrary",)),               # time is a recurrence
    )(u, w, s, direct_input, clamps, unclamps)

    return u_new, s_new.astype(jnp.bool_), w_new


def _reference_step(u, w, s, direct_input, clamps, unclamps, *,
                    dt=1.0, tau=20.0, R=1.0, resting_potential=-70.6,
                    spike_threshold=-40.0, sharpness=2.0, firing_threshold=-50.4,
                    a_w=4.0, b_w=0.0805, tau_w=144.0):
    """Pure-JAX single-step reference mirroring the PyTorch module."""
    s_f = s.astype(jnp.float32)
    I = jnp.zeros_like(u) + direct_input
    u = u * (1.0 - s_f) + s_f * resting_potential
    u = u - dt / tau * (u - resting_potential - R * I)
    u = u + dt / tau * (sharpness * jnp.exp((u - firing_threshold) / sharpness))
    u = u - R * w
    s_new = u > spike_threshold
    s_new = jnp.logical_or(jnp.logical_and(s_new, jnp.logical_not(unclamps)), clamps)
    w_new = w + dt / tau_w * (a_w * (u - resting_potential) - w
                              + b_w * tau_w * s_new.astype(jnp.float32))
    return u, s_new, w_new


if __name__ == "__main__":
    # Population shape (P, D) = (8, 128); D maps to the 128-lane axis.
    pop_shape = (8, 128)
    T = 6
    u_rest = -70.6

    key = jax.random.PRNGKey(0)
    k_drive, k_clamp, k_unclamp = jax.random.split(key, 3)

    # Initial state like the module __init__: u = u_rest, w = 0, s = False.
    u0 = jnp.full(pop_shape, u_rest, jnp.float32)
    w0 = jnp.zeros(pop_shape, jnp.float32)
    s0 = jnp.zeros(pop_shape, jnp.int8)

    # Two-level injected current: clearly supra-threshold or clearly
    # sub-threshold, so spike decisions are never numerically borderline.
    drive = jax.random.uniform(k_drive, (T,) + pop_shape, jnp.float32)
    high = drive > 0.5
    direct_input = jnp.where(high, 850.0, 20.0).astype(jnp.float32)

    clamps_b = jax.random.bernoulli(k_clamp, 0.05, (T,) + pop_shape)
    # Only unclamp strongly-driven neurons on the final step: the module's exp
    # firing term is unbounded (matches PyTorch), and suppressing the reset of
    # a strongly-driven neuron mid-run would overflow f32 in both kernel and
    # reference, making the validation meaningless.
    t_idx = jnp.arange(T).reshape((T,) + (1,) * len(pop_shape))
    allow_unclamp = jnp.logical_or(jnp.logical_not(high), t_idx == T - 1)
    unclamps_b = jnp.logical_and(
        jax.random.bernoulli(k_unclamp, 0.2, (T,) + pop_shape), allow_unclamp)

    clamps = clamps_b.astype(jnp.int8)
    unclamps = unclamps_b.astype(jnp.int8)

    fwd = jax.jit(functools.partial(aelif_forward, dt=1.0))
    u, s, w = fwd(u0, w0, s0, direct_input, clamps, unclamps)
    jax.block_until_ready((u, s, w))

    # Pure-JAX reference, stepped T times.
    ur, sr, wr = u0, jnp.zeros(pop_shape, jnp.bool_), w0
    for t in range(T):
        ur, sr, wr = _reference_step(ur, wr, sr, direct_input[t],
                                     clamps_b[t], unclamps_b[t], dt=1.0)

    assert jnp.allclose(u, ur, rtol=5e-4, atol=5e-2), "u mismatch"
    assert bool(jnp.all(s == sr)), "s mismatch"
    assert jnp.allclose(w, wr, rtol=5e-4, atol=5e-2), "w mismatch"

    print("KERNEL_OK")
</pallas_src>

<mosaic_0001>
module attributes {stable_mosaic.version = 11 : i64} {
  func.func @_aelif_kernel(%arg0: i32, %arg1: memref<8x128xf32, #tpu.memory_space<vmem>>, %arg2: memref<8x128xf32, #tpu.memory_space<vmem>>, %arg3: memref<8x128xi8, #tpu.memory_space<vmem>>, %arg4: memref<1x8x128xf32, #tpu.memory_space<vmem>>, %arg5: memref<1x8x128xi8, #tpu.memory_space<vmem>>, %arg6: memref<1x8x128xi8, #tpu.memory_space<vmem>>, %arg7: memref<8x128xf32, #tpu.memory_space<vmem>>, %arg8: memref<8x128xi8, #tpu.memory_space<vmem>>, %arg9: memref<8x128xf32, #tpu.memory_space<vmem>>, %arg10: memref<8x128xf32, #tpu.memory_space<vmem>>) attributes {dimension_semantics = [#tpu.dimension_semantics<arbitrary>], iteration_bounds = array<i64: 6>, scalar_prefetch = 0 : i64, scratch_operands = 1 : i64, tpu.core_type = #tpu.core_type<tc>, window_params = [{pipeline_mode = #tpu.pipeline_mode<synchronous>, transform_indices = @transform_0, window_bounds = array<i64: 8, 128>}, {pipeline_mode = #tpu.pipeline_mode<synchronous>, transform_indices = @transform_1, window_bounds = array<i64: 8, 128>}, {pipeline_mode = #tpu.pipeline_mode<synchronous>, transform_indices = @transform_2, window_bounds = array<i64: 8, 128>}, {transform_indices = @transform_3, window_bounds = array<i64: 1, 8, 128>}, {transform_indices = @transform_4, window_bounds = array<i64: 1, 8, 128>}, {transform_indices = @transform_5, window_bounds = array<i64: 1, 8, 128>}, {pipeline_mode = #tpu.pipeline_mode<synchronous>, transform_indices = @transform_6, window_bounds = array<i64: 8, 128>}, {pipeline_mode = #tpu.pipeline_mode<synchronous>, transform_indices = @transform_7, window_bounds = array<i64: 8, 128>}, {pipeline_mode = #tpu.pipeline_mode<synchronous>, transform_indices = @transform_8, window_bounds = array<i64: 8, 128>}]} {
    %c0_i32 = arith.constant 0 : i32
    %0 = arith.cmpi eq, %arg0, %c0_i32 : i32
    %1 = arith.extui %0 : i1 to i32
    %c0_i32_0 = arith.constant 0 : i32
    %2 = arith.cmpi ne, %1, %c0_i32_0 : i32
    scf.if %2 {
      %c0_37 = arith.constant 0 : index
      %c0_38 = arith.constant 0 : index
      %66 = vector.load %arg1[%c0_37, %c0_38] : memref<8x128xf32, #tpu.memory_space<vmem>>, vector<8x128xf32>
      %c0_39 = arith.constant 0 : index
      %c0_40 = arith.constant 0 : index
      %67 = vector.load %arg7[%c0_39, %c0_40] : memref<8x128xf32, #tpu.memory_space<vmem>>, vector<8x128xf32>
      tpu.vector_store %arg7[%c0_39, %c0_40], %66 {strides = array<i32>} : memref<8x128xf32, #tpu.memory_space<vmem>>, vector<8x128xf32>,
      %c0_41 = arith.constant 0 : index
      %c0_42 = arith.constant 0 : index
      %68 = vector.load %arg2[%c0_41, %c0_42] : memref<8x128xf32, #tpu.memory_space<vmem>>, vector<8x128xf32>
      %c0_43 = arith.constant 0 : index
      %c0_44 = arith.constant 0 : index
      %69 = vector.load %arg9[%c0_43, %c0_44] : memref<8x128xf32, #tpu.memory_space<vmem>>, vector<8x128xf32>
      tpu.vector_store %arg9[%c0_43, %c0_44], %68 {strides = array<i32>} : memref<8x128xf32, #tpu.memory_space<vmem>>, vector<8x128xf32>,
      %c0_45 = arith.constant 0 : index
      %c0_46 = arith.constant 0 : index
      %70 = vector.load %arg3[%c0_45, %c0_46] : memref<8x128xi8, #tpu.memory_space<vmem>>, vector<8x128xi8>
      %71 = arith.sitofp %70 : vector<8x128xi8> to vector<8x128xf32>
      %c0_47 = arith.constant 0 : index
      %c0_48 = arith.constant 0 : index
      %72 = vector.load %arg10[%c0_47, %c0_48] : memref<8x128xf32, #tpu.memory_space<vmem>>, vector<8x128xf32>
      tpu.vector_store %arg10[%c0_47, %c0_48], %71 {strides = array<i32>} : memref<8x128xf32, #tpu.memory_space<vmem>>, vector<8x128xf32>,
    } else {
    }
    %c0 = arith.constant 0 : index
    %c0_1 = arith.constant 0 : index
    %3 = vector.load %arg7[%c0, %c0_1] : memref<8x128xf32, #tpu.memory_space<vmem>>, vector<8x128xf32>
    %c0_2 = arith.constant 0 : index
    %c0_3 = arith.constant 0 : index
    %4 = vector.load %arg9[%c0_2, %c0_3] : memref<8x128xf32, #tpu.memory_space<vmem>>, vector<8x128xf32>
    %c0_4 = arith.constant 0 : index
    %c0_5 = arith.constant 0 : index
    %5 = vector.load %arg10[%c0_4, %c0_5] : memref<8x128xf32, #tpu.memory_space<vmem>>, vector<8x128xf32>
    %c0_6 = arith.constant 0 : index
    %c0_7 = arith.constant 0 : index
    %c0_8 = arith.constant 0 : index
    %6 = vector.load %arg4[%c0_6, %c0_7, %c0_8] : memref<1x8x128xf32, #tpu.memory_space<vmem>>, vector<1x8x128xf32>
    %7 = vector.shape_cast %6 : vector<1x8x128xf32> to vector<8x128xf32>
    %c0_9 = arith.constant 0 : index
    %c0_10 = arith.constant 0 : index
    %c0_11 = arith.constant 0 : index
    %8 = vector.load %arg5[%c0_9, %c0_10, %c0_11] : memref<1x8x128xi8, #tpu.memory_space<vmem>>, vector<1x8x128xi8>
    %9 = vector.shape_cast %8 : vector<1x8x128xi8> to vector<8x128xi8>
    %10 = arith.sitofp %9 : vector<8x128xi8> to vector<8x128xf32>
    %c0_12 = arith.constant 0 : index
    %c0_13 = arith.constant 0 : index
    %c0_14 = arith.constant 0 : index
    %11 = vector.load %arg6[%c0_12, %c0_13, %c0_14] : memref<1x8x128xi8, #tpu.memory_space<vmem>>, vector<1x8x128xi8>
    %12 = vector.shape_cast %11 : vector<1x8x128xi8> to vector<8x128xi8>
    %13 = arith.sitofp %12 : vector<8x128xi8> to vector<8x128xf32>
    %cst = arith.constant 1.000000e+00 : f32
    %14 = vector.broadcast %cst : f32 to vector<8x128xf32>
    %15 = arith.subf %14, %5 : vector<8x128xf32>
    %16 = arith.mulf %3, %15 : vector<8x128xf32>
    %cst_15 = arith.constant -7.060000e+01 : f32
    %17 = vector.broadcast %cst_15 : f32 to vector<8x128xf32>
    %18 = arith.mulf %5, %17 : vector<8x128xf32>
    %19 = arith.addf %16, %18 : vector<8x128xf32>
    %cst_16 = arith.constant -7.060000e+01 : f32
    %20 = vector.broadcast %cst_16 : f32 to vector<8x128xf32>
    %21 = arith.subf %19, %20 : vector<8x128xf32>
    %cst_17 = arith.constant 1.000000e+00 : f32
    %22 = vector.broadcast %cst_17 : f32 to vector<8x128xf32>
    %23 = arith.mulf %22, %7 : vector<8x128xf32>
    %24 = arith.subf %21, %23 : vector<8x128xf32>
    %cst_18 = arith.constant 5.000000e-02 : f32
    %25 = vector.broadcast %cst_18 : f32 to vector<8x128xf32>
    %26 = arith.mulf %25, %24 : vector<8x128xf32>
    %27 = arith.subf %19, %26 : vector<8x128xf32>
    %cst_19 = arith.constant -5.040000e+01 : f32
    %28 = vector.broadcast %cst_19 : f32 to vector<8x128xf32>
    %29 = arith.subf %27, %28 : vector<8x128xf32>
    %cst_20 = arith.constant 5.000000e-01 : f32
    %30 = vector.broadcast %cst_20 : f32 to vector<8x128xf32>
    %31 = arith.mulf %29, %30 : vector<8x128xf32>
    %32 = math.exp %31 : vector<8x128xf32>
    %cst_21 = arith.constant 2.000000e+00 : f32
    %33 = vector.broadcast %cst_21 : f32 to vector<8x128xf32>
    %34 = arith.mulf %33, %32 : vector<8x128xf32>
    %cst_22 = arith.constant 5.000000e-02 : f32
    %35 = vector.broadcast %cst_22 : f32 to vector<8x128xf32>
    %36 = arith.mulf %35, %34 : vector<8x128xf32>
    %37 = arith.addf %27, %36 : vector<8x128xf32>
    %cst_23 = arith.constant 1.000000e+00 : f32
    %38 = vector.broadcast %cst_23 : f32 to vector<8x128xf32>
    %39 = arith.mulf %38, %4 : vector<8x128xf32>
    %40 = arith.subf %37, %39 : vector<8x128xf32>
    %cst_24 = arith.constant -4.000000e+01 : f32
    %41 = vector.broadcast %cst_24 : f32 to vector<8x128xf32>
    %42 = arith.cmpf ogt, %40, %41 : vector<8x128xf32>
    %43 = arith.extui %42 : vector<8x128xi1> to vector<8x128xi32>
    %44 = arith.sitofp %43 : vector<8x128xi32> to vector<8x128xf32>
    %cst_25 = arith.constant 1.000000e+00 : f32
    %45 = vector.broadcast %cst_25 : f32 to vector<8x128xf32>
    %46 = arith.subf %45, %13 : vector<8x128xf32>
    %47 = arith.mulf %44, %46 : vector<8x128xf32>
    %48 = arith.maximumf %47, %10 : vector<8x128xf32>
    %cst_26 = arith.constant -7.060000e+01 : f32
    %49 = vector.broadcast %cst_26 : f32 to vector<8x128xf32>
    %50 = arith.subf %40, %49 : vector<8x128xf32>
    %cst_27 = arith.constant 4.000000e+00 : f32
    %51 = vector.broadcast %cst_27 : f32 to vector<8x128xf32>
    %52 = arith.mulf %51, %50 : vector<8x128xf32>
    %53 = arith.subf %52, %4 : vector<8x128xf32>
    %cst_28 = arith.constant 1.159200e+01 : f32
    %54 = vector.broadcast %cst_28 : f32 to vector<8x128xf32>
    %55 = arith.mulf %54, %48 : vector<8x128xf32>
    %56 = arith.addf %53, %55 : vector<8x128xf32>
    %cst_29 = arith.constant 0.0069444445 : f32
    %57 = vector.broadcast %cst_29 : f32 to vector<8x128xf32>
    %58 = arith.mulf %57, %56 : vector<8x128xf32>
    %59 = arith.addf %4, %58 : vector<8x128xf32>
    %c0_30 = arith.constant 0 : index
    %c0_31 = arith.constant 0 : index
    %60 = vector.load %arg7[%c0_30, %c0_31] : memref<8x128xf32, #tpu.memory_space<vmem>>, vector<8x128xf32>
    tpu.vector_store %arg7[%c0_30, %c0_31], %40 {strides = array<i32>} : memref<8x128xf32, #tpu.memory_space<vmem>>, vector<8x128xf32>,
    %c0_32 = arith.constant 0 : index
    %c0_33 = arith.constant 0 : index
    %61 = vector.load %arg9[%c0_32, %c0_33] : memref<8x128xf32, #tpu.memory_space<vmem>>, vector<8x128xf32>
    tpu.vector_store %arg9[%c0_32, %c0_33], %59 {strides = array<i32>} : memref<8x128xf32, #tpu.memory_space<vmem>>, vector<8x128xf32>,
    %c0_34 = arith.constant 0 : index
    %c0_35 = arith.constant 0 : index
    %62 = vector.load %arg10[%c0_34, %c0_35] : memref<8x128xf32, #tpu.memory_space<vmem>>, vector<8x128xf32>
    tpu.vector_store %arg10[%c0_34, %c0_35], %48 {strides = array<i32>} : memref<8x128xf32, #tpu.memory_space<vmem>>, vector<8x128xf32>,
    %c5_i32 = arith.constant 5 : i32
    %63 = arith.cmpi eq, %arg0, %c5_i32 : i32
    %64 = arith.extui %63 : i1 to i32
    %c0_i32_36 = arith.constant 0 : i32
    %65 = arith.cmpi ne, %64, %c0_i32_36 : i32
    scf.if %65 {
      %66 = arith.fptosi %48 : vector<8x128xf32> to vector<8x128xi8>
      %c0_37 = arith.constant 0 : index
      %c0_38 = arith.constant 0 : index
      %67 = vector.load %arg8[%c0_37, %c0_38] : memref<8x128xi8, #tpu.memory_space<vmem>>, vector<8x128xi8>
      tpu.vector_store %arg8[%c0_37, %c0_38], %66 {strides = array<i32>} : memref<8x128xi8, #tpu.memory_space<vmem>>, vector<8x128xi8>,
    } else {
    }
    return
  }
  func.func @transform_0(%arg0: i32) -> (i32, i32) {
    %c0_i32 = arith.constant 0 : i32
    %c0_i32_0 = arith.constant 0 : i32
    %c0_i32_1 = arith.constant 0 : i32
    return %c0_i32, %c0_i32_0 : i32, i32
  }
  func.func @transform_1(%arg0: i32) -> (i32, i32) {
    %c0_i32 = arith.constant 0 : i32
    %c0_i32_0 = arith.constant 0 : i32
    %c0_i32_1 = arith.constant 0 : i32
    return %c0_i32, %c0_i32_0 : i32, i32
  }
  func.func @transform_2(%arg0: i32) -> (i32, i32) {
    %c0_i32 = arith.constant 0 : i32
    %c0_i32_0 = arith.constant 0 : i32
    %c0_i32_1 = arith.constant 0 : i32
    return %c0_i32, %c0_i32_0 : i32, i32
  }
  func.func @transform_3(%arg0: i32) -> (i32, i32, i32) {
    %c0_i32 = arith.constant 0 : i32
    %c0_i32_0 = arith.constant 0 : i32
    %c0_i32_1 = arith.constant 0 : i32
    return %arg0, %c0_i32, %c0_i32_0 : i32, i32, i32
  }
  func.func @transform_4(%arg0: i32) -> (i32, i32, i32) {
    %c0_i32 = arith.constant 0 : i32
    %c0_i32_0 = arith.constant 0 : i32
    %c0_i32_1 = arith.constant 0 : i32
    return %arg0, %c0_i32, %c0_i32_0 : i32, i32, i32
  }
  func.func @transform_5(%arg0: i32) -> (i32, i32, i32) {
    %c0_i32 = arith.constant 0 : i32
    %c0_i32_0 = arith.constant 0 : i32
    %c0_i32_1 = arith.constant 0 : i32
    return %arg0, %c0_i32, %c0_i32_0 : i32, i32, i32
  }
  func.func @transform_6(%arg0: i32) -> (i32, i32) {
    %c0_i32 = arith.constant 0 : i32
    %c0_i32_0 = arith.constant 0 : i32
    %c0_i32_1 = arith.constant 0 : i32
    return %c0_i32, %c0_i32_0 : i32, i32
  }
  func.func @transform_7(%arg0: i32) -> (i32, i32) {
    %c0_i32 = arith.constant 0 : i32
    %c0_i32_0 = arith.constant 0 : i32
    %c0_i32_1 = arith.constant 0 : i32
    return %c0_i32, %c0_i32_0 : i32, i32
  }
  func.func @transform_8(%arg0: i32) -> (i32, i32) {
    %c0_i32 = arith.constant 0 : i32
    %c0_i32_0 = arith.constant 0 : i32
    %c0_i32_1 = arith.constant 0 : i32
    return %c0_i32, %c0_i32_0 : i32, i32
  }
}

</mosaic_0001>

<bundles_post_ra>
// kernel: aelif_forward.1
= control target key start
LH: loop header
LB: loop body
LE: loop exit
PB: predicated region body
PF: predicated region fallthrough
CT: control target
= control target key end

     0   :  { %14 = vsyncpa [#allocation4], 0  ;;  %s909_s0 = inlined_call_operand.vmem [shape: f32[8,128], index: 0, kind: input, shape index: {}, may-alias: {0,6}]   ;;  %s910_s1 = inlined_call_operand.vmem [shape: f32[8,128], index: 1, kind: input, shape index: {}, may-alias: {1,8}]   ;;  %s911_s2 = inlined_call_operand.vmem [shape: s8[8,128], index: 2, kind: input, shape index: {}, may-alias: {2,7}]   ;;  %s912_s3 = inlined_call_operand.hbm [shape: f32[6,8,128], index: 3, kind: input, shape index: {}]   ;;  %s913_s4 = inlined_call_operand.vmem [shape: s8[6,8,128], index: 4, kind: input, shape index: {}]   ;;  %s914_s5 = inlined_call_operand.hbm [shape: s8[6,8,128], index: 5, kind: input, shape index: {}]   ;;  %s915_s6 = inlined_call_operand.vmem [shape: f32[8,128], index: 6, kind: output, shape index: {0}, may-alias: {0,6}]   ;;  %s916_s7 = inlined_call_operand.vmem [shape: s8[8,128], index: 7, kind: output, shape index: {1}, may-alias: {2,7}]   ;;  %s917_s8 = inlined_call_operand.vmem [shape: f32[8,128], index: 8, kind: output, shape index: {2}, may-alias: {1,8}]  }
   0x1   :  { %16 = vsyncpa [#allocation4 + $0x1], 0 }
   0x2   :  { %17 = vsyncpa [#allocation6], 0 }
   0x3   :  { %19 = vsyncpa [#allocation6 + $0x1], 0  ;;  %s723_s27 = smov 0   ;;  %s725_s28 = smov 0  }
   0x4   :  { %s727_s29 = smov 0   ;;  %s729_s30 = smov 0  }
   0x5 LB: > { %s742_s9 = sadd.s32 4294967295, %s673_s30   ;;  %s745_s10 = sadd.s32 1, %s673_s30   ;;  %s673_s30 = sphi %s729_s30, %s929_s30   ;;  %s669_s29 = sphi %s727_s29, %s928_s29   ;;  %s665_s28 = sphi %s725_s28, %s927_s28   ;;  %s661_s27 = sphi %s723_s27, %s926_s27  }
   0x6   : > { %s92_s11 = ssub.s32 %s673_s30, %s745_s10  ;;  %s95_s12 = sadd.s32 1, %s669_s29 }
   0x7   : > { %p93_p0 = scmp.eq.s32.totalorder %s92_s11, 0  ;;  %p102_p1 = scmp.ne.s32.totalorder %s669_s29, %s665_s28 }
   0x8   : > { %p103_p2 = scmp.eq.s32.totalorder %s673_s30, 0  ;;  %p108_p3 = scmp.ne.s32.totalorder %s665_s28, %s661_s27 }
   0x9   : > { %s755_s13 = scalar_select %p93_p0, %s669_s29, %s95_s12  }
   0xa   : > { %p104_p4 = por %p103_p2, %p102_p1  ;;  %p109_p5 = scmp.eq.s32.totalorder %s742_s9, 0 }
   0xb   : > { %p539_p6 = scmp.lt.s32.totalorder %s673_s30, 6  ;;  %s764_s15 = sand.u32 1, %s669_s29  }
   0xc   : > { %p759_p7 = por %p109_p5, %p108_p3  ;;  %s512_s16 = sshll.u32 %s764_s15, 3 }
   0xd   : > { %s513_s17 = sshll.u32 %s673_s30, 7  ;;  %s260_s21 = scalar_lea.vmem [#allocation3], %s512_s16 }
   0xe   : > { %s919_s14 = scalar_select %p759_p7, 1, 0 }
   0xf   : > { %s771_s20 = scalar_lea.hbm %s912_s3, %s513_s17  ;;  %s267_s22 = sshll.u32 %s260_s21, 4  ;;  %s773_s22 = int_to_ptr.vmem [resolvable:$true] %s267_s22 }
  0x10   : > { %p775_p8 = pnand %p539_p6, %p104_p4  ;;  %s257_s24 = scalar_lea.sflag [#allocation4], %s764_s15 }
  0x11   : > { %s575_s25 = scalar_lea.hbm %s771_s20, 128  ;;  %s580_s11 = scalar_lea.hbm %s912_s3, 768 }
  0x12   : > { %p576_p11 = scmp.ne.s32.totalorder %s771_s20, %s575_s25  ;;  %p577_p12 = pneg %p775_p8 }
  0x13   : > { %p581_p1 = scmp.lt.u32.totalorder %s771_s20, %s912_s3  ;;  %p582_p2 = scmp.lt.u32.totalorder %s580_s11, %s575_s25 }
  0x14   : > { %p578_p13 = pnand %p577_p12, %p576_p11  ;;  %p584_p4 = scmp.lt.u32.totalorder %s575_s25, %s771_s20 }
  0x15   : > { %p583_p3 = por %p582_p2, %p581_p1 }
  0x16   : > { %p579_p0 = pneg %p578_p13 }
  0x17   : > { %p585_p5 = por %p584_p4, %p583_p3 }
  0x19   : > { %p586_p6 = pnand %p585_p5, %p579_p0 }
  0x1b   : > { %589 = shalt.err (!%p586_p6)
}
  0x1c   : > { %s590_s17 = scalar_lea.vmem %s773_s22, 128  ;;  %s675_s18 = smov [#allocation3]  }
  0x1d   : > { %p591_p11 = scmp.ne.s32.totalorder %s773_s22, %s590_s17  ;;  %s595_s19 = sshll.u32 %s675_s18, 4  ;;  %s596_s19 = int_to_ptr.vmem [resolvable:$false] %s595_s19 }
  0x1e   : > { %s597_s21 = scalar_lea.vmem %s596_s19, 256  ;;  %p598_p10 = scmp.lt.s32.totalorder %s773_s22, %s596_s19 }
  0x1f   : > { %p593_p13 = pnand %p591_p11, %p577_p12  ;;  %p599_p1 = scmp.lt.s32.totalorder %s597_s21, %s590_s17 }
  0x21   : > { %p594_p9 = pneg %p593_p13  ;;  %p600_p2 = por %p599_p1, %p598_p10 }
  0x23   : > { %p601_p3 = pnand %p600_p2, %p594_p9 }
  0x25   : > { %604 = shalt.err (!%p601_p3)
}
  0x26   : > { %535 = dma.hbm_to_vmem [thread:$0]  (!%p775_p8), %s771_s20, 128, %s773_s22, %s257_s24  }
  0x27   : > { %p921_p0 = scmp.lt.s32.totalorder %s673_s30, 7  ;;  %p922_p4 = scmp.ge.s32.totalorder %s673_s30, 1 }
  0x28   : > { %s514_s26 = sshll.u32 %s764_s15, 1  ;;  %s515_s27 = sshll.u32 %s673_s30, 5 }
  0x29   : > { %p811_p5 = pnand %p922_p4, %p921_p0  ;;  %s820_s16 = scalar_lea.hbm %s914_s5, %s515_s27 }
  0x2a   : > { %s285_s17 = scalar_lea.vmem [#allocation5], %s514_s26  ;;  %s282_s20 = scalar_lea.sflag [#allocation6], %s764_s15 }
  0x2b   : > { %s923_s25 = scalar_select %p811_p5, 1, 0 }
  0x2c   : > { %s292_s18 = sshll.u32 %s285_s17, 4  ;;  %s605_s22 = scalar_lea.hbm %s820_s16, 32  ;;  %s293_s18 = int_to_ptr.vmem [resolvable:$true] %s292_s18 }
  0x2d   : > { %p606_p9 = scmp.ne.s32.totalorder %s820_s16, %s605_s22  ;;  %s610_s19 = scalar_lea.hbm %s914_s5, 192 }
  0x2e   : > { %p611_p11 = scmp.lt.u32.totalorder %s820_s16, %s914_s5  ;;  %p612_p13 = scmp.lt.u32.totalorder %s610_s19, %s605_s22 }
  0x2f   : > { %p608_p10 = pnand %p606_p9, %p577_p12  ;;  %p614_p2 = scmp.lt.u32.totalorder %s605_s22, %s820_s16 }
  0x30   : > { %p613_p1 = por %p612_p13, %p611_p11 }
  0x31   : > { %p609_p6 = pneg %p608_p10 }
  0x32   : > { %p615_p3 = por %p614_p2, %p613_p1 }
  0x34   : > { %p616_p0 = pnand %p615_p3, %p609_p6 }
  0x36   : > { %619 = shalt.err (!%p616_p0)
}
  0x37   : > { %s620_s15 = scalar_lea.vmem %s293_s18, 32  ;;  %s676_s26 = smov [#allocation5]  }
  0x38   : > { %p621_p4 = scmp.ne.s32.totalorder %s293_s18, %s620_s15  ;;  %s625_s11 = sshll.u32 %s676_s26, 4  ;;  %s626_s11 = int_to_ptr.vmem [resolvable:$false] %s625_s11 }
  0x39   : > { %s627_s12 = scalar_lea.vmem %s626_s11, 64  ;;  %p628_p7 = scmp.lt.s32.totalorder %s293_s18, %s626_s11 }
  0x3a   : > { %p623_p9 = pnand %p621_p4, %p577_p12  ;;  %p629_p5 = scmp.lt.s32.totalorder %s627_s12, %s620_s15 }
  0x3c   : > { %p624_p10 = pneg %p623_p9  ;;  %p630_p11 = por %p629_p5, %p628_p7 }
  0x3e   : > { %p631_p13 = pnand %p630_p11, %p624_p10 }
  0x40   : > { %634 = shalt.err (!%p631_p13)
}
  0x41   : > { %538 = dma.hbm_to_vmem [thread:$0]  (!%p775_p8), %s820_s16, 32, %s293_s18, %s282_s20  }
  0x42   : > { %p924_p6 = scmp.ne.s32.totalorder %s923_s25, 0 }
  0x43   : > { %s303_s17 = sand.u32 (!%p924_p6), 1, %s665_s28   ;;  %p925_p12 = scmp.ne.s32.totalorder (!%p924_p6), %s919_s14, 0 }
  0x44   : > { %301 = sbr.rel (%p924_p6) target bundleno = 150 (0x96), region = 44  ;;  %s517_s22 = sshll.u32 (!%p924_p6), %s303_s17, 3 }
  0x45   : > { %s304_s30 = scalar_lea.sflag (!%p924_p6), [#allocation4], %s303_s17  ;;  %s307_s24 = scalar_lea.vmem (!%p924_p6), [#allocation3], %s517_s22 }
  0x4b   : > { %652 = dma.done.wait (%p925_p12), %s304_s30, 128  }
  0x4c   : > { %654 = vsyncadd (%p925_p12), %s304_s30, 4294967168  ;;  %s518_s19 = sshll.u32 %s303_s17, 1  ;;  %s313_s21 = scalar_lea.sflag [#allocation6], %s303_s17 }
  0x4d   : > { %s849_s23 = scalar_lea.vmem [#allocation5], %s518_s19 }
  0x4e   : > { %656 = dma.done.wait (%p925_p12), %s313_s21, 32  }
  0x4f   : > { %658 = vsyncadd (%p925_p12), %s313_s21, 4294967264  ;;  %p353_p7 = scmp.lt.s32.totalorder %s742_s9, 5  ;;  %p520_p8 = scmp.ne.s32.totalorder %s742_s9, 0 }
  0x50   : > { %v361_v0 = vld [vmem:[%s909_s0] sm:$0xff] (!%p520_p8) }
  0x51   : > { %s354_s25 = scalar_select %p353_p7, %s742_s9, 5 }
  0x52   : > { %360 = sbr.rel (%p520_p8) target bundleno = 89 (0x59), region = 56  ;;  %v363_v1 = vld [vmem:[%s910_s1] sm:$0xff] (!%p520_p8)  ;;  %362 = vst [vmem:[%s915_s6] sm:$0xff] (!%p520_p8), %v361_v0 }
  0x53   : > { %s519_s16 = sshll.u32 %s354_s25, 1  ;;  %v365_v2 = vld [vmem:[%s911_s2] sm:$0x3] (!%p520_p8)  ;;  %364 = vst [vmem:[%s917_s8] sm:$0xff] (!%p520_p8), %v363_v1 }
  0x54   : > { %s860_s27 = scalar_lea.vmem %s913_s4, %s519_s16  ;;  %v366_v3 = vunpack.c.0.s8 (!%p520_p8), %v365_v2 }
  0x56   : > { %v367_v4 = vcvt.s32.f32 (!%p520_p8), %v366_v3 }
  0x58   : > { %368 = vst [vmem:[#allocation2] sm:$0xff] (!%p520_p8), %v367_v4 }
  0x59 PF: > { %v369_v5 = vld [vmem:[%s915_s6] sm:$0xff]  ;;  %v372_v11 = vld [vmem:[%s307_s24] sm:$0xff]  ;;  %v376_v19 = vld [vmem:[%s849_s23] sm:$0x3]  ;;  %v677_v33 = vmov 0.0   ;;  %p525_p5 = scmp.ne.s32.totalorder %s742_s9, 5 }
  0x5a   : > { %v377_v20 = vunpack.c.0.s8 %v376_v19  ;;  %v373_v23 = vld [vmem:[%s860_s27] sm:$0x3] }
  0x5b   : > { %v370_v26 = vld [vmem:[%s917_s8] sm:$0xff]  ;;  %v374_v28 = vunpack.c.0.s8 %v373_v23 }
  0x5c   : > { %v378_v25 = vcvt.s32.f32 %v377_v20 }
  0x5d   : > { %v375_v31 = vcvt.s32.f32 %v374_v28 }
  0x5e   : > { %v398_v30 = vsub.f32 1.0, %v378_v25 }
  0x5f   : > { %v371_v6 = vld [vmem:[#allocation2] sm:$0xff] }
  0x60   : > { %v379_v7 = vsub.f32 1.0, %v371_v6  ;;  %v381_v8 = vmul.f32 -70.6, %v371_v6 }
  0x62   : > { %v380_v9 = vmul.f32 %v379_v7, %v369_v5 }
  0x64   : > { %v382_v10 = vadd.f32 %v381_v8, %v380_v9 }
  0x66   : > { %v521_v12 = vadd.f32 70.6, %v382_v10 }
  0x68   : > { %v384_v13 = vsub.f32 %v521_v12, %v372_v11 }
  0x6a   : > { %v385_v14 = vmul.f32 0.05, %v384_v13 }
  0x6c   : > { %v386_v15 = vsub.f32 %v382_v10, %v385_v14 }
  0x6e   : > { %v522_v16 = vadd.f32 50.4, %v386_v15 }
  0x70   : > { %v388_v17 = vmul.f32 0.5, %v522_v16 }
  0x72   : > { %v389_v18 = vmul.f32 1.442695, %v388_v17 }
  0x74   : > { %573 = vpow2.f32 %v389_v18 }
  0x7e   : > { %v574_v21 = vpop.eup %573 }
  0x7f   : > { %v391_v22 = vmul.f32 2.0, %v574_v21 }
  0x81   : > { %v392_v24 = vmul.f32 0.05, %v391_v22 }
  0x83   : > { %v393_v27 = vadd.f32 %v392_v24, %v386_v15 }
  0x85   : > { %v394_v29 = vsub.f32 %v393_v27, %v370_v26 }
  0x87   : > { %vm395_vm0 = vcmp.gt.f32.partialorder %v394_v29, -40.0  ;;  %408 = vst [vmem:[%s915_s6] sm:$0xff] %v394_v29  ;;  %v524_v32 = vadd.f32 70.6, %v394_v29 }
  0x88   : > { %v523_v34 = vsel %vm395_vm0, 1.0, %v677_v33 }
  0x89   : > { %v399_v35 = vmul.f32 %v523_v34, %v398_v30  ;;  %v402_v36 = vmul.f32 4.0, %v524_v32 }
  0x8b   : > { %v400_v37 = vmax.f32 %v399_v35, %v375_v31  ;;  %v403_v38 = vsub.f32 %v402_v36, %v370_v26 }
  0x8d   : > { %v404_v39 = vmul.f32 11.592, %v400_v37  ;;  %410 = vst [vmem:[#allocation2] sm:$0xff] %v400_v37  ;;  %v415_v43 = vtrunc.f32 (!%p525_p5), %v400_v37 }
  0x8f   : > { %v405_v40 = vadd.f32 %v404_v39, %v403_v38  ;;  %414 = sbr.rel (%p525_p5) target bundleno = 150 (0x96), region = 60  ;;  %v416_v44 = vpack.c.f32.eXmY (!%p525_p5), %v415_v43, %v415_v43, 312 }
  0x91   : > { %v406_v41 = vmul.f32 0.0069444445, %v405_v40  ;;  %v420_v45 = vpack.c.b8 (!%p525_p5), %v416_v44, %v416_v44 }
  0x93   : > { %v407_v42 = vadd.f32 %v406_v41, %v370_v26  ;;  %422 = vst [vmem:[%s916_s7] sm:$0x3] (!%p525_p5), %v420_v45 }
  0x95   : > { %409 = vst [vmem:[%s917_s8] sm:$0xff] %v407_v42 }
  0x96 PF: > { %p22_p1 = scmp.ge.s32.totalorder %s745_s10, 8   ;;  %s926_s27 = smov %s665_s28 }
  0x97   : > { %s927_s28 = smov %s669_s29  ;;  %s928_s29 = smov %s755_s13 }
  0x98   : > { %s929_s30 = smov %s745_s10  ;;  %24 = sbr.rel (!%p22_p1) target bundleno = 5 (0x5), region = 120 }
  0x9f   :  { %446 = vsyncpa [#allocation4], 1 }
  0xa0   :  { %448 = vsyncpa [#allocation4 + $0x1], 1 }
  0xa1   :  { %449 = vsyncpa [#allocation6], 1 }
  0xa2   :  { %451 = vsyncpa [#allocation6 + $0x1], 1 }

</bundles_post_ra>
